<compile_context>
chip_gen: v6e
topology: v6e:2x2x1
jax: 0.10.0
libtpu: 0.0.40
codegen_flags: <defaults>
</compile_context>

<pallas_src>
import functools
import math

import numpy as np
import jax
import jax.numpy as jnp
from jax.experimental import pallas as pl
from jax.experimental.pallas import tpu as pltpu


_SQRT_HALF = 0.7071067811865476       # 1/sqrt(2)
_SQRT_2_OVER_PI = 0.7978845608028654  # sqrt(2/pi)


def _gelu_exact(x):
    # PyTorch's default nn.GELU() (exact erf form), computed in f32.
    return 0.5 * x * (1.0 + jax.lax.erf(x * _SQRT_HALF))


def _gelu_tanh(x):
    # tanh approximation, used only if lax.erf does not lower in Mosaic
    # (max abs deviation ~1e-3 vs the exact form).
    return 0.5 * x * (1.0 + jnp.tanh(_SQRT_2_OVER_PI * (x + 0.044715 * x * x * x)))


@functools.lru_cache(maxsize=None)
def _erf_lowers_in_pallas():
    """Probe once whether lax.erf lowers in Mosaic; else use the tanh GELU."""
    def _probe(x_ref, o_ref):
        o_ref[...] = jax.lax.erf(x_ref[...])
    try:
        out = pl.pallas_call(
            _probe, out_shape=jax.ShapeDtypeStruct((8, 128), jnp.float32)
        )(jnp.zeros((8, 128), jnp.float32))
        jax.block_until_ready(out)
        return True
    except Exception:  # noqa: BLE001 - any lowering/compile failure -> fallback
        return False


def _default_vmem_limit_bytes():
    try:
        cap = pltpu.get_tpu_info().vmem_capacity_bytes
    except Exception:  # noqa: BLE001 - conservative fallback if query fails
        cap = 64 * 1024 * 1024
    # Leave headroom below physical (v7x: ~56 MiB; v6e/v5e: capped at 112 MiB).
    return min(int(cap * 7 // 8), 112 * 1024 * 1024)


def _pick_m_tile(m, block_m):
    if m > block_m:
        return block_m
    # Small M: split into two >=128-row, 8-aligned tiles so both v7x
    # TensorCores get work; otherwise keep the full (possibly ragged) extent.
    if m >= 256 and m % 16 == 0:
        return m // 2
    return m


def _pick_hidden_tile(hidden, in_f, out_f, tm, itemsize, budget):
    """Largest hidden tile (full or a 128-multiple divisor) fitting the budget."""
    def vmem_cost(th):
        weights = 2 * (in_f * th + th * out_f) * itemsize      # double-buffered
        biases = 2 * (th + out_f) * 4
        x_out = 2 * tm * in_f * itemsize + 2 * tm * out_f * 4  # x + out tiles
        acc = tm * out_f * 4                                   # f32 accumulator
        inter = tm * th * (4 + itemsize)                       # f32 act + bf16 cast
        return weights + biases + x_out + acc + inter

    if hidden <= 128 or vmem_cost(hidden) <= budget:
        return hidden
    t = (hidden // 128) * 128
    while t >= 128:
        if hidden % t == 0 and vmem_cost(t) <= budget:
            return t
        t -= 128
    # TODO(synk): hidden has no 128-multiple divisor fitting the VMEM budget;
    # fall back to the full extent and rely on the raised vmem_limit_bytes.
    return hidden


def _mlp_kernel(x_ref, w1_ref, b1_ref, w2_ref, b2_ref, o_ref, acc_ref, *, gelu):
    # Grid: (m_tiles, hidden_tiles); hidden is the inner reduction axis.
    h_idx = pl.program_id(1)

    @pl.when(h_idx == 0)
    def _():
        acc_ref[...] = jnp.zeros_like(acc_ref)

    # fc1 chunk on the MXU: (tm, in) @ (in, th), bf16 operands, f32 accumulate.
    h = jnp.dot(x_ref[...], w1_ref[...], preferred_element_type=jnp.float32)
    h = h + b1_ref[...]          # bias + activation stay in f32 (VPU/EUP)
    h = gelu(h)
    # dropout(p=0.0) is the identity -> nothing to do.
    # fc2 partial product, accumulated over hidden tiles in f32 VMEM scratch.
    acc_ref[...] += jnp.dot(h.astype(w2_ref.dtype), w2_ref[...],
                            preferred_element_type=jnp.float32)

    @pl.when(h_idx == pl.num_programs(1) - 1)
    def _():
        o_ref[...] = (acc_ref[...] + b2_ref[...]).astype(o_ref.dtype)


def prepare_params(w1, b1, w2, b2, dtype=jnp.float32):
    """One-time prep: PyTorch nn.Linear layout (out,in) -> (in,out).

    Do this at parameter-load time so every forward call avoids an HBM->HBM
    weight transpose.
    """
    return {
        "w1": jnp.asarray(w1, dtype).T,       # (in_features, hidden_features)
        "b1": jnp.asarray(b1, jnp.float32),   # (hidden_features,)
        "w2": jnp.asarray(w2, dtype).T,       # (hidden_features, out_features)
        "b2": jnp.asarray(b2, jnp.float32),   # (out_features,)
    }


def mlp_pallas(x, w1_io, b1, w2_io, b2, *, drop_rate=0.0, block_m=512,
               compute_dtype=jnp.bfloat16, vmem_limit_bytes=None):
    """Fused Mlp forward: fc2(drop(gelu(fc1(x)))) with drop identity (p=0).

    Args:
      x:     (..., in_features)
      w1_io: (in_features, hidden_features)   -- pre-transposed (prepare_params)
      b1:    (hidden_features,)
      w2_io: (hidden_features, out_features)  -- pre-transposed (prepare_params)
      b2:    (out_features,)
    """
    if drop_rate != 0.0:
        # TODO(synk): training-time Dropout (p>0) mask generation is not fused;
        # the module default drop=0.0 makes both Dropout layers the identity.
        raise NotImplementedError("Only drop=0.0 (identity dropout) is fused.")

    in_f, hidden = w1_io.shape
    hidden2, out_f = w2_io.shape
    assert hidden2 == hidden and x.shape[-1] == in_f

    cdt = jnp.dtype(compute_dtype)
    itemsize = np.dtype(cdt).itemsize
    w1c = w1_io.astype(cdt)
    w2c = w2_io.astype(cdt)
    b1_2 = b1.reshape(1, hidden).astype(jnp.float32)
    b2_2 = b2.reshape(1, out_f).astype(jnp.float32)

    orig_shape = x.shape
    out_dtype = x.dtype
    x2 = x.reshape(-1, in_f).astype(cdt)
    M = x2.shape[0]

    if vmem_limit_bytes is None:
        vmem_limit_bytes = _default_vmem_limit_bytes()

    tm = _pick_m_tile(M, block_m)
    th = _pick_hidden_tile(hidden, in_f, out_f, tm, itemsize,
                           budget=int(vmem_limit_bytes) * 3 // 4)
    grid = (pl.cdiv(M, tm), pl.cdiv(hidden, th))

    gelu = _gelu_exact if _erf_lowers_in_pallas() else _gelu_tanh
    kernel = functools.partial(_mlp_kernel, gelu=gelu)

    out2 = pl.pallas_call(
        kernel,
        out_shape=jax.ShapeDtypeStruct((M, out_f), out_dtype),
        grid_spec=pltpu.PrefetchScalarGridSpec(
            num_scalar_prefetch=0,
            grid=grid,
            in_specs=[
                pl.BlockSpec((tm, in_f), lambda i, h: (i, 0)),   # x tile
                pl.BlockSpec((in_f, th), lambda i, h: (0, h)),   # fc1 weight chunk
                pl.BlockSpec((1, th), lambda i, h: (0, h)),      # fc1 bias chunk
                pl.BlockSpec((th, out_f), lambda i, h: (h, 0)),  # fc2 weight chunk
                pl.BlockSpec((1, out_f), lambda i, h: (0, 0)),   # fc2 bias
            ],
            out_specs=pl.BlockSpec((tm, out_f), lambda i, h: (i, 0)),
            scratch_shapes=[pltpu.VMEM((tm, out_f), jnp.float32)],
        ),
        compiler_params=pltpu.CompilerParams(
            dimension_semantics=("parallel", "arbitrary"),
            vmem_limit_bytes=int(vmem_limit_bytes),
        ),
    )(x2, w1c, b1_2, w2c, b2_2)

    return out2.reshape(*orig_shape[:-1], out_f)


def mlp_forward(x, dim, params, drop_rate=0.0):
    """Mirror of Mlp.forward(x, dim). `dim` is unused by the PyTorch module."""
    del dim  # unused in the reference forward
    return mlp_pallas(x, params["w1"], params["b1"], params["w2"], params["b2"],
                      drop_rate=drop_rate)


def _mlp_ref(x, w1_pt, b1, w2_pt, b2):
    # Pure-JAX f32 reference matching PyTorch: fc2(gelu_exact(fc1(x))).
    h = x @ w1_pt.T + b1
    h = 0.5 * h * (1.0 + jax.lax.erf(h * _SQRT_HALF))
    return h @ w2_pt.T + b2


if __name__ == "__main__":
    key = jax.random.PRNGKey(0)
    kx, kw1, kb1, kw2, kb2 = jax.random.split(key, 5)

    # Small but lane-dense shapes: batch=2, seq=8, in=128, hidden=256, out=128.
    B, N, IN, HID, OUT = 2, 8, 128, 256, 128
    x = jax.random.normal(kx, (B, N, IN), dtype=jnp.float32)

    # Parameters in PyTorch nn.Linear layout (out_features, in_features).
    lim1 = 1.0 / math.sqrt(IN)
    lim2 = 1.0 / math.sqrt(HID)
    w1_pt = jax.random.uniform(kw1, (HID, IN), jnp.float32, -lim1, lim1)
    b1 = jax.random.uniform(kb1, (HID,), jnp.float32, -lim1, lim1)
    w2_pt = jax.random.uniform(kw2, (OUT, HID), jnp.float32, -lim2, lim2)
    b2 = jax.random.uniform(kb2, (OUT,), jnp.float32, -lim2, lim2)

    # One-time parameter prep (weight transpose happens here, not per call).
    params = prepare_params(w1_pt, b1, w2_pt, b2)

    y = mlp_forward(x, dim=(4, 2), params=params)
    y = jax.block_until_ready(y)

    y_ref = _mlp_ref(x, w1_pt, b1, w2_pt, b2)
    # bf16 matmul operands with f32 accumulation -> ~1e-2 relative tolerance.
    np.testing.assert_allclose(np.asarray(y), np.asarray(y_ref),
                               rtol=2e-2, atol=2e-2)

    print("KERNEL_OK")
</pallas_src>

<mosaic_0001>
module attributes {stable_mosaic.version = 11 : i64} {
  func.func @_probe(%arg0: memref<8x128xf32, #tpu.memory_space<vmem>>, %arg1: memref<8x128xf32, #tpu.memory_space<vmem>>) attributes {dimension_semantics = [], scalar_prefetch = 0 : i64, scratch_operands = 0 : i64, tpu.core_type = #tpu.core_type<tc>} {
    %c0 = arith.constant 0 : index
    %c0_0 = arith.constant 0 : index
    %0 = vector.load %arg0[%c0, %c0_0] : memref<8x128xf32, #tpu.memory_space<vmem>>, vector<8x128xf32>
    %1 = math.erf %0 : vector<8x128xf32>
    %c0_1 = arith.constant 0 : index
    %c0_2 = arith.constant 0 : index
    %2 = vector.load %arg1[%c0_1, %c0_2] : memref<8x128xf32, #tpu.memory_space<vmem>>, vector<8x128xf32>
    tpu.vector_store %arg1[%c0_1, %c0_2], %1 {strides = array<i32>} : memref<8x128xf32, #tpu.memory_space<vmem>>, vector<8x128xf32>,
    return
  }
}

module attributes {stable_mosaic.version = 11 : i64} {
  func.func @_mlp_kernel(%arg0: i32, %arg1: i32, %arg2: memref<16x128xbf16, #tpu.memory_space<vmem>>, %arg3: memref<128x256xbf16, #tpu.memory_space<vmem>>, %arg4: memref<1x256xf32, #tpu.memory_space<vmem>>, %arg5: memref<256x128xbf16, #tpu.memory_space<vmem>>, %arg6: memref<1x128xf32, #tpu.memory_space<vmem>>, %arg7: memref<16x128xf32, #tpu.memory_space<vmem>>, %arg8: memref<16x128xf32, #tpu.memory_space<vmem>>) attributes {dimension_semantics = [#tpu.dimension_semantics<parallel>, #tpu.dimension_semantics<arbitrary>], iteration_bounds = array<i64: 1, 1>, scalar_prefetch = 0 : i64, scratch_operands = 1 : i64, tpu.core_type = #tpu.core_type<tc>, window_params = [{transform_indices = @transform_0, window_bounds = array<i64: 16, 128>}, {transform_indices = @transform_1, window_bounds = array<i64: 128, 256>}, {transform_indices = @transform_2, window_bounds = array<i64: 1, 256>}, {transform_indices = @transform_3, window_bounds = array<i64: 256, 128>}, {pipeline_mode = #tpu.pipeline_mode<synchronous>, transform_indices = @transform_4, window_bounds = array<i64: 1, 128>}, {transform_indices = @transform_5, window_bounds = array<i64: 16, 128>}]} {
    %c0_i32 = arith.constant 0 : i32
    %0 = arith.cmpi eq, %arg1, %c0_i32 : i32
    %1 = arith.extui %0 : i1 to i32
    %c0_i32_0 = arith.constant 0 : i32
    %2 = arith.cmpi ne, %1, %c0_i32_0 : i32
    scf.if %2 {
      %cst_19 = arith.constant 0.000000e+00 : f32
      %31 = vector.broadcast %cst_19 : f32 to vector<16x128xf32>
      %c0_20 = arith.constant 0 : index
      %c0_21 = arith.constant 0 : index
      %32 = vector.load %arg8[%c0_20, %c0_21] : memref<16x128xf32, #tpu.memory_space<vmem>>, vector<16x128xf32>
      tpu.vector_store %arg8[%c0_20, %c0_21], %31 {strides = array<i32>} : memref<16x128xf32, #tpu.memory_space<vmem>>, vector<16x128xf32>,
    } else {
    }
    %c0 = arith.constant 0 : index
    %c0_1 = arith.constant 0 : index
    %3 = vector.load %arg2[%c0, %c0_1] : memref<16x128xbf16, #tpu.memory_space<vmem>>, vector<16x128xbf16>
    %c0_2 = arith.constant 0 : index
    %c0_3 = arith.constant 0 : index
    %4 = vector.load %arg3[%c0_2, %c0_3] : memref<128x256xbf16, #tpu.memory_space<vmem>>, vector<128x256xbf16>
    %cst = arith.constant dense<0.000000e+00> : vector<16x256xf32>
    %5 = tpu.matmul %3, %4, %cst {dimension_numbers = #tpu.dot_dimension_numbers<[1], [0], [0], [1], [0, 0, 1, 1], [], []>} : vector<16x128xbf16>, vector<128x256xbf16>, vector<16x256xf32> -> vector<16x256xf32>
    %c0_4 = arith.constant 0 : index
    %c0_5 = arith.constant 0 : index
    %6 = vector.load %arg4[%c0_4, %c0_5] : memref<1x256xf32, #tpu.memory_space<vmem>>, vector<1x256xf32>
    %7 = vector.broadcast %6 : vector<1x256xf32> to vector<16x256xf32>
    %8 = arith.addf %5, %7 : vector<16x256xf32>
    %cst_6 = arith.constant 5.000000e-01 : f32
    %9 = vector.broadcast %cst_6 : f32 to vector<16x256xf32>
    %10 = arith.mulf %9, %8 : vector<16x256xf32>
    %cst_7 = arith.constant 4.471500e-02 : f32
    %11 = vector.broadcast %cst_7 : f32 to vector<16x256xf32>
    %12 = arith.mulf %11, %8 : vector<16x256xf32>
    %13 = arith.mulf %12, %8 : vector<16x256xf32>
    %14 = arith.mulf %13, %8 : vector<16x256xf32>
    %15 = arith.addf %8, %14 : vector<16x256xf32>
    %cst_8 = arith.constant 0.797884583 : f32
    %16 = vector.broadcast %cst_8 : f32 to vector<16x256xf32>
    %17 = arith.mulf %16, %15 : vector<16x256xf32>
    %18 = math.tanh %17 : vector<16x256xf32>
    %cst_9 = arith.constant 1.000000e+00 : f32
    %19 = vector.broadcast %cst_9 : f32 to vector<16x256xf32>
    %20 = arith.addf %19, %18 : vector<16x256xf32>
    %21 = arith.mulf %10, %20 : vector<16x256xf32>
    %c0_10 = arith.constant 0 : index
    %c0_11 = arith.constant 0 : index
    %22 = vector.load %arg8[%c0_10, %c0_11] : memref<16x128xf32, #tpu.memory_space<vmem>>, vector<16x128xf32>
    %23 = arith.truncf %21 : vector<16x256xf32> to vector<16x256xbf16>
    %c0_12 = arith.constant 0 : index
    %c0_13 = arith.constant 0 : index
    %24 = vector.load %arg5[%c0_12, %c0_13] : memref<256x128xbf16, #tpu.memory_space<vmem>>, vector<256x128xbf16>
    %cst_14 = arith.constant dense<0.000000e+00> : vector<16x128xf32>
    %25 = tpu.matmul %23, %24, %cst_14 {dimension_numbers = #tpu.dot_dimension_numbers<[1], [0], [0], [1], [0, 0, 1, 1], [], []>} : vector<16x256xbf16>, vector<256x128xbf16>, vector<16x128xf32> -> vector<16x128xf32>
    %26 = arith.addf %22, %25 : vector<16x128xf32>
    %c0_15 = arith.constant 0 : index
    %c0_16 = arith.constant 0 : index
    %27 = vector.load %arg8[%c0_15, %c0_16] : memref<16x128xf32, #tpu.memory_space<vmem>>, vector<16x128xf32>
    tpu.vector_store %arg8[%c0_15, %c0_16], %26 {strides = array<i32>} : memref<16x128xf32, #tpu.memory_space<vmem>>, vector<16x128xf32>,
    %c0_i32_17 = arith.constant 0 : i32
    %28 = arith.cmpi eq, %arg1, %c0_i32_17 : i32
    %29 = arith.extui %28 : i1 to i32
    %c0_i32_18 = arith.constant 0 : i32
    %30 = arith.cmpi ne, %29, %c0_i32_18 : i32
    scf.if %30 {
      %c0_19 = arith.constant 0 : index
      %c0_20 = arith.constant 0 : index
      %31 = vector.load %arg8[%c0_19, %c0_20] : memref<16x128xf32, #tpu.memory_space<vmem>>, vector<16x128xf32>
      %c0_21 = arith.constant 0 : index
      %c0_22 = arith.constant 0 : index
      %32 = vector.load %arg6[%c0_21, %c0_22] : memref<1x128xf32, #tpu.memory_space<vmem>>, vector<1x128xf32>
      %33 = vector.broadcast %32 : vector<1x128xf32> to vector<16x128xf32>
      %34 = arith.addf %31, %33 : vector<16x128xf32>
      %c0_23 = arith.constant 0 : index
      %c0_24 = arith.constant 0 : index
      %35 = vector.load %arg7[%c0_23, %c0_24] : memref<16x128xf32, #tpu.memory_space<vmem>>, vector<16x128xf32>
      tpu.vector_store %arg7[%c0_23, %c0_24], %34 {strides = array<i32>} : memref<16x128xf32, #tpu.memory_space<vmem>>, vector<16x128xf32>,
    } else {
    }
    return
  }
  func.func @transform_0(%arg0: i32, %arg1: i32) -> (i32, i32) {
    %c0_i32 = arith.constant 0 : i32
    %c0_i32_0 = arith.constant 0 : i32
    return %arg0, %c0_i32 : i32, i32
  }
  func.func @transform_1(%arg0: i32, %arg1: i32) -> (i32, i32) {
    %c0_i32 = arith.constant 0 : i32
    %c0_i32_0 = arith.constant 0 : i32
    return %c0_i32, %arg1 : i32, i32
  }
  func.func @transform_2(%arg0: i32, %arg1: i32) -> (i32, i32) {
    %c0_i32 = arith.constant 0 : i32
    %c0_i32_0 = arith.constant 0 : i32
    return %c0_i32, %arg1 : i32, i32
  }
  func.func @transform_3(%arg0: i32, %arg1: i32) -> (i32, i32) {
    %c0_i32 = arith.constant 0 : i32
    %c0_i32_0 = arith.constant 0 : i32
    return %arg1, %c0_i32 : i32, i32
  }
  func.func @transform_4(%arg0: i32, %arg1: i32) -> (i32, i32) {
    %c0_i32 = arith.constant 0 : i32
    %c0_i32_0 = arith.constant 0 : i32
    %c0_i32_1 = arith.constant 0 : i32
    return %c0_i32, %c0_i32_0 : i32, i32
  }
  func.func @transform_5(%arg0: i32, %arg1: i32) -> (i32, i32) {
    %c0_i32 = arith.constant 0 : i32
    %c0_i32_0 = arith.constant 0 : i32
    return %arg0, %c0_i32 : i32, i32
  }
}

</mosaic_0001>

<bundles_post_ra>
// kernel: tpu_custom_call.1
= control target key start
LH: loop header
LB: loop body
LE: loop exit
PB: predicated region body
PF: predicated region fallthrough
CT: control target
= control target key end

     0   :  { %6 = vsyncpa [#allocation3], 0  ;;  %s105_s0 = inlined_call_operand.hbm [shape: f32[8,128], index: 0, kind: input, shape index: {}]   ;;  %s106_s1 = inlined_call_operand.hbm [shape: f32[8,128], index: 1, kind: output, shape index: {}]  }
   0x1   :  { %7 = vsyncpa [#allocation4], 0  ;;  %s87_s6 = smov [#allocation2]  }
   0x2   :  { %s14_s7 = sshll.u32 %s87_s6, 4  ;;  %s15_s7 = int_to_ptr.vmem [resolvable:$true] %s14_s7 }
   0x3   :  { %s51_s8 = scalar_lea.vmem %s15_s7, 128  ;;  %p56_p1 = scmp.lt.s32.totalorder %s15_s7, %s15_s7 }
   0x4   :  { %p52_p0 = scmp.ne.s32.totalorder %s15_s7, %s51_s8  ;;  %p57_p2 = scmp.lt.s32.totalorder %s51_s8, %s51_s8 }
   0x6   :  { %p58_p3 = por %p57_p2, %p56_p1 }
   0x8   :  { %p59_p4 = pnand %p58_p3, %p52_p0 }
   0xa   :  { %62 = shalt.err (!%p59_p4)
}
   0xb   :  { %17 = dma.hbm_to_vmem [thread:$0]  %s105_s0, 128, %s15_s7, [#allocation3]  }
   0xc   :  { %83 = dma.done.wait [#allocation3], 128  }
   0xd   :  { %84 = vsyncadd [#allocation3], 4294967168  ;;  %v21_v0 = vld [vmem:[#allocation2] sm:$0xff]  ;;  %s88_s11 = smov [#allocation5]  }
   0xe   :  { %41 = verf.f32 %v21_v0  ;;  %s30_s12 = sshll.u32 %s88_s11, 4  ;;  %s31_s12 = int_to_ptr.vmem [resolvable:$true] %s30_s12 }
   0xf   :  { %s63_s13 = scalar_lea.vmem %s31_s12, 128  ;;  %p68_p6 = scmp.lt.s32.totalorder %s31_s12, %s31_s12 }
  0x10   :  { %p64_p5 = scmp.ne.s32.totalorder %s31_s12, %s63_s13  ;;  %p69_p7 = scmp.lt.s32.totalorder %s63_s13, %s63_s13 }
  0x12   :  { %p70_p8 = por %p69_p7, %p68_p6 }
  0x14   :  { %p71_p9 = pnand %p70_p8, %p64_p5 }
  0x1b   :  { %v42_v1 = vpop.eup %41 }
  0x1c   :  { %23 = vst [vmem:[#allocation5] sm:$0xff] %v42_v1 }
  0x1d   :  { %74 = shalt.err (!%p71_p9)
}
  0x1e   :  { %33 = dma.vmem_to_hbm [thread:$0]  %s31_s12, 128, %s106_s1, [#allocation4]  }
  0x1f   :  { %85 = dma.done.wait [#allocation4], 128  }
  0x20   :  { %86 = vsyncadd [#allocation4], 4294967168 }
  0x21   :  { %37 = vsyncpa [#allocation3], 1 }
  0x22   :  { %38 = vsyncpa [#allocation4], 1 }

// kernel: tpu_custom_call.1
= control target key start
LH: loop header
LB: loop body
LE: loop exit
PB: predicated region body
PF: predicated region fallthrough
CT: control target
= control target key end

     0   :  { %10 = vsyncpa [#allocation4], 0  ;;  %s738_s0 = inlined_call_operand.hbm [shape: bf16[16,128], index: 0, kind: input, shape index: {}]   ;;  %s739_s1 = inlined_call_operand.hbm [shape: bf16[128,256], index: 1, kind: input, shape index: {}]   ;;  %s740_s2 = inlined_call_operand.vmem [shape: f32[1,256], index: 2, kind: input, shape index: {}]   ;;  %s741_s3 = inlined_call_operand.hbm [shape: bf16[256,128], index: 3, kind: input, shape index: {}]   ;;  %s742_s4 = inlined_call_operand.vmem [shape: f32[1,128], index: 4, kind: input, shape index: {}]   ;;  %s743_s5 = inlined_call_operand.hbm [shape: f32[16,128], index: 5, kind: output, shape index: {}]  }
   0x1   :  { %11 = vsyncpa [#allocation7], 0 }
   0x2   :  { %12 = vsyncpa [#allocation5], 0  ;;  %s675_s18 = smov [#allocation6]  }
   0x3   :  { %s30_s19 = sshll.u32 %s675_s18, 4  ;;  %s31_s19 = int_to_ptr.vmem [resolvable:$true] %s30_s19 }
   0x4   :  { %s597_s20 = scalar_lea.vmem %s31_s19, 2048  ;;  %p602_p1 = scmp.lt.s32.totalorder %s31_s19, %s31_s19 }
   0x5   :  { %p598_p0 = scmp.ne.s32.totalorder %s31_s19, %s597_s20  ;;  %p603_p2 = scmp.lt.s32.totalorder %s597_s20, %s597_s20 }
   0x7   :  { %p604_p3 = por %p603_p2, %p602_p1 }
   0x9   :  { %p605_p4 = pnand %p604_p3, %p598_p0 }
   0xb   :  { %608 = shalt.err (!%p605_p4)
}
   0xc   :  { %s676_s21 = smov 128   ;;  %s677_s22 = smov 8  }
   0xd   :  { %36 = dma.hbm_to_vmem [thread:$0]  %s739_s1, 2048, %s31_s19, [#allocation7], %s676_s21, %s676_s21, %s677_s22  }
   0xe   :  { %s678_s25 = smov [#allocation3]  }
   0xf   :  { %s18_s26 = sshll.u32 %s678_s25, 4  ;;  %s19_s26 = int_to_ptr.vmem [resolvable:$true] %s18_s26 }
  0x10   :  { %s617_s27 = scalar_lea.vmem %s19_s26, 128  ;;  %p622_p6 = scmp.lt.s32.totalorder %s19_s26, %s19_s26 }
  0x11   :  { %p618_p5 = scmp.ne.s32.totalorder %s19_s26, %s617_s27  ;;  %p623_p7 = scmp.lt.s32.totalorder %s617_s27, %s617_s27 }
  0x13   :  { %p624_p8 = por %p623_p7, %p622_p6 }
  0x15   :  { %p625_p9 = pnand %p624_p8, %p618_p5 }
  0x17   :  { %628 = shalt.err (!%p625_p9)
}
  0x18   :  { %s679_s28 = smov 64   ;;  %s680_s29 = smov 4  }
  0x19   :  { %24 = dma.hbm_to_vmem [thread:$0]  %s738_s0, 128, %s19_s26, [#allocation4], %s679_s28, %s679_s28, %s680_s29  }
  0x1a   :  { %s681_s7 = smov [#allocation8]  }
  0x1b   :  { %s44_s8 = sshll.u32 %s681_s7, 4  ;;  %s45_s8 = int_to_ptr.vmem [resolvable:$true] %s44_s8 }
  0x1c   :  { %s637_s1 = scalar_lea.vmem %s45_s8, 2048  ;;  %p642_p11 = scmp.lt.s32.totalorder %s45_s8, %s45_s8 }
  0x1d   :  { %p638_p10 = scmp.ne.s32.totalorder %s45_s8, %s637_s1  ;;  %p643_p12 = scmp.lt.s32.totalorder %s637_s1, %s637_s1 }
  0x1f   :  { %p644_p13 = por %p643_p12, %p642_p11 }
  0x21   :  { %p645_p0 = pnand %p644_p13, %p638_p10 }
  0x23   :  { %648 = shalt.err (!%p645_p0)
}
  0x24   :  { %50 = dma.hbm_to_vmem [thread:$0]  %s741_s3, 2048, %s45_s8, [#allocation7], %s679_s28, %s679_s28, %s680_s29  }
  0x25   :  { %669 = dma.done.wait [#allocation4], 128  }
  0x26   :  { %670 = vsyncadd [#allocation4], 4294967168 }
  0x27   :  { %671 = dma.done.wait [#allocation7], 4096  }
  0x28   :  { %672 = vsyncadd [#allocation7], 4294963200  ;;  %v682_v0 = vmov 0   ;;  %v540_v1 = vld [vmem:[#allocation6 + $0x74] ss:$8 sps:$4 sm:$0xff]   ;;  %v569_v22 = vld [vmem:[#allocation8 + $0x68] sm:$0xff]   ;;  %v89_v34 = vlaneseq }
  0x29   :  { %217 = vmatprep.mubr.bf16.mxu0 %v682_v0  ;;  %v542_v2 = vld [vmem:[#allocation6 + $0x70] ss:$8 sps:$4 sm:$0xff]   ;;  %185 = vmatprep.subr.bf16.mxu0 %v540_v1  ;;  %v543_v3 = vld [vmem:[#allocation6 + $0x64] ss:$8 sps:$4 sm:$0xff]   ;;  %v545_v4 = vld [vmem:[#allocation6 + $0x60] ss:$8 sps:$4 sm:$0xff]  }
  0x2a   :  { %186 = vmatpush1.bf16.msra.mxu0 %v542_v2  ;;  %v546_v5 = vld [vmem:[#allocation6 + $0x54] ss:$8 sps:$4 sm:$0xff]   ;;  %v548_v6 = vld [vmem:[#allocation6 + $0x50] ss:$8 sps:$4 sm:$0xff]   ;;  %v549_v7 = vld [vmem:[#allocation6 + $0x44] ss:$8 sps:$4 sm:$0xff]  }
  0x2b   :  { %187 = vmatprep.subr.bf16.mxu0 %v543_v3  ;;  %v551_v8 = vld [vmem:[#allocation6 + $0x40] ss:$8 sps:$4 sm:$0xff]   ;;  %v552_v9 = vld [vmem:[#allocation6 + $0x34] ss:$8 sps:$4 sm:$0xff]   ;;  %v554_v10 = vld [vmem:[#allocation6 + $0x30] ss:$8 sps:$4 sm:$0xff]  }
  0x2c   :  { %v555_v11 = vld [vmem:[#allocation6 + $0x24] ss:$8 sps:$4 sm:$0xff]   ;;  %v557_v12 = vld [vmem:[#allocation6 + $0x20] ss:$8 sps:$4 sm:$0xff]   ;;  %v558_v13 = vld [vmem:[#allocation6 + $0x14] ss:$8 sps:$4 sm:$0xff]  }
  0x2d   :  { %v560_v14 = vld [vmem:[#allocation6 + $0x10] ss:$8 sps:$4 sm:$0xff]   ;;  %v561_v15 = vld [vmem:[#allocation6 + $0x4] ss:$8 sps:$4 sm:$0xff]   ;;  %v563_v16 = vld [vmem:[#allocation6] ss:$8 sps:$4 sm:$0xff]  }
  0x2e   :  { %188 = vmatpush1.bf16.msra.mxu0 %v545_v4  ;;  %v564_v17 = vld [vmem:[#allocation3] sm:$0xff]   ;;  %v567_v20 = vld [vmem:[#allocation8 + $0x70] sm:$0xff]   ;;  %v570_v23 = vld [vmem:[#allocation8 + $0x28] sm:$0xff]   ;;  %v90_v35 = vshrl.u32 %v89_v34, 7  ;;  %s683_s12 = smov [#allocation9]  }
  0x2f   :  { %189 = vmatprep.subr.bf16.mxu0 %v546_v5  ;;  %v565_v18 = vld [vmem:[#allocation8 + $0x78] sm:$0xff]   ;;  %v568_v21 = vld [vmem:[#allocation8 + $0x30] sm:$0xff]   ;;  %v571_v24 = vld [vmem:[#allocation8 + $0x60] sm:$0xff]   ;;  %s462_s13 = sshll.u32 %s683_s12, 4  ;;  %s463_s13 = int_to_ptr.vmem [resolvable:$true] %s462_s13 }
  0x30   :  { %v566_v19 = vld [vmem:[#allocation8 + $0x38] sm:$0xff]   ;;  %509 = vmatprep.subr.bf16.mxu1 %v565_v18  ;;  %v572_v25 = vld [vmem:[#allocation8 + $0x20] sm:$0xff]   ;;  %v575_v28 = vld [vmem:[#allocation8 + $0x50] sm:$0xff]   ;;  %v91_v36 = vsub.s32 0, %v90_v35  ;;  %v95_v38 = vsub.s32 1, %v90_v35  ;;  %s649_s14 = scalar_lea.vmem %s463_s13, 256  ;;  %p654_p2 = scmp.lt.s32.totalorder %s463_s13, %s463_s13 }
  0x31   :  { %510 = vmatpush3.bf16.msra.mxu1 %v566_v19  ;;  %v573_v26 = vld [vmem:[#allocation8 + $0x58] sm:$0xff]   ;;  %v576_v29 = vld [vmem:[#allocation8 + $0x10] sm:$0xff]   ;;  %v577_v30 = vld [vmem:[#allocation8 + $0x48] sm:$0xff]   ;;  %p650_p1 = scmp.ne.s32.totalorder %s463_s13, %s649_s14  ;;  %p655_p3 = scmp.lt.s32.totalorder %s649_s14, %s649_s14 }
  0x32   :  { %190 = vmatpush1.bf16.msra.mxu0 %v548_v6  ;;  %511 = vmatprep.subr.bf16.mxu1 %v567_v20  ;;  %v574_v27 = vld [vmem:[#allocation8 + $0x18] sm:$0xff]   ;;  %v578_v31 = vld [vmem:[#allocation8 + $0x8] sm:$0xff]   ;;  %v579_v32 = vld [vmem:[#allocation8 + $0x40] sm:$0xff]  }
  0x33   :  { %191 = vmatprep.subr.bf16.mxu0 %v549_v7  ;;  %v580_v33 = vld [vmem:[#allocation8] sm:$0xff]   ;;  %v87_v37 = vld [vmem:[%s740_s2] sm:$0x3]  ;;  %p656_p4 = por %p655_p3, %p654_p2 }
  0x34   :  { %v92_v39 = vrot.slane %v87_v37, %v91_v36  ;;  %v96_v40 = vrot.slane %v87_v37, %v95_v38 }
  0x35   :  { %512 = vmatpush3.bf16.msra.mxu1 %v568_v21  ;;  %p657_p5 = pnand %p656_p4, %p650_p1 }
  0x36   :  { %192 = vmatpush1.bf16.msra.mxu0 %v551_v8  ;;  %513 = vmatprep.subr.bf16.mxu1 %v569_v22 }
  0x37   :  { %193 = vmatprep.subr.bf16.mxu0 %v552_v9 }
  0x39   :  { %514 = vmatpush3.bf16.msra.mxu1 %v570_v23 }
  0x3a   :  { %194 = vmatpush1.bf16.msra.mxu0 %v554_v10  ;;  %515 = vmatprep.subr.bf16.mxu1 %v571_v24 }
  0x3b   :  { %195 = vmatprep.subr.bf16.mxu0 %v555_v11 }
  0x3d   :  { %516 = vmatpush3.bf16.msra.mxu1 %v572_v25  ;;  %v508_v25 = vld [vmem:[%s742_s4] ss:$0 sm:$0xff] }
  0x3e   :  { %196 = vmatpush1.bf16.msra.mxu0 %v557_v12  ;;  %517 = vmatprep.subr.bf16.mxu1 %v573_v26 }
  0x3f   :  { %197 = vmatprep.subr.bf16.mxu0 %v558_v13 }
  0x41   :  { %518 = vmatpush3.bf16.msra.mxu1 %v574_v27 }
  0x42   :  { %198 = vmatpush1.bf16.msra.mxu0 %v560_v14  ;;  %519 = vmatprep.subr.bf16.mxu1 %v575_v28 }
  0x43   :  { %199 = vmatprep.subr.bf16.mxu0 %v561_v15 }
  0x45   :  { %520 = vmatpush3.bf16.msra.mxu1 %v576_v29 }
  0x46   :  { %200 = vmatpush1.bf16.msra.mxu0 %v563_v16  ;;  %521 = vmatprep.subr.bf16.mxu1 %v577_v30 }
  0x49   :  { %218 = vmatmul.mubr.bf16.vlgmr.msra.gmra.mxu0 %v564_v17  ;;  %522 = vmatpush3.bf16.msra.mxu1 %v578_v31 }
  0x4a   :  { %523 = vmatprep.subr.bf16.mxu1 %v579_v32 }
  0x4d   :  { %524 = vmatpush3.bf16.msra.mxu1 %v580_v33 }
 0x109   :  { %v219_v41 = vpop.f32.mrf.mxu0 }
 0x10a   :  { %v220_v42 = vadd.f32 %v219_v41, %v92_v39 }
 0x10b   :  { %v221_v43 = vpop.f32.mrf.mxu0 }
 0x10c   :  { %v232_v44 = vmul.f32 0.044715, %v220_v42  ;;  %v222_v45 = vadd.f32 %v221_v43, %v96_v40  ;;  %v228_v16 = vmul.f32 0.5, %v220_v42 }
 0x10d   :  { %v223_v46 = vpop.f32.mrf.mxu0 }
 0x10e   :  { %v236_v47 = vmul.f32 %v232_v44, %v220_v42  ;;  %v233_v48 = vmul.f32 0.044715, %v222_v45  ;;  %v224_v49 = vadd.f32 %v223_v46, %v92_v39  ;;  %v229_v13 = vmul.f32 0.5, %v222_v45 }
 0x10f   :  { %v225_v50 = vpop.f32.mrf.mxu0 }
 0x110   :  { %v240_v51 = vmul.f32 %v236_v47, %v220_v42  ;;  %v234_v52 = vmul.f32 0.044715, %v224_v49  ;;  %v226_v53 = vadd.f32 %v225_v50, %v96_v40  ;;  %v237_v54 = vmul.f32 %v233_v48, %v222_v45 }
 0x111   :  { %v230_v11 = vmul.f32 0.5, %v224_v49 }
 0x112   :  { %v238_v55 = vmul.f32 %v234_v52, %v224_v49  ;;  %v235_v56 = vmul.f32 0.044715, %v226_v53  ;;  %v241_v57 = vmul.f32 %v237_v54, %v222_v45  ;;  %v244_v58 = vadd.f32 %v240_v51, %v220_v42 }
 0x113   :  { %v231_v14 = vmul.f32 0.5, %v226_v53 }
 0x114   :  { %v242_v59 = vmul.f32 %v238_v55, %v224_v49  ;;  %v239_v60 = vmul.f32 %v235_v56, %v226_v53  ;;  %v245_v61 = vadd.f32 %v241_v57, %v222_v45  ;;  %v248_v62 = vmul.f32 0.7978846, %v244_v58 }
 0x116   :  { %v243_v63 = vmul.f32 %v239_v60, %v226_v53  ;;  %v249_v0 = vmul.f32 0.7978846, %v245_v61  ;;  %v246_v1 = vadd.f32 %v242_v59, %v224_v49 }
 0x118   :  { %v247_v2 = vadd.f32 %v243_v63, %v226_v53  ;;  %581 = vtanh.f32 %v249_v0  ;;  %v250_v3 = vmul.f32 0.7978846, %v246_v1 }
 0x119   :  { %583 = vtanh.f32 %v248_v62 }
 0x11a   :  { %v251_v4 = vmul.f32 0.7978846, %v247_v2  ;;  %585 = vtanh.f32 %v250_v3 }
 0x11c   :  { %587 = vtanh.f32 %v251_v4 }
 0x125   :  { %v582_v5 = vpop.eup %581 }
 0x126   :  { %v584_v6 = vpop.eup %583  ;;  %v257_v8 = vadd.f32 1.0, %v582_v5 }
 0x127   :  { %v586_v7 = vpop.eup %585  ;;  %v256_v12 = vadd.f32 1.0, %v584_v6 }
 0x128   :  { %v258_v9 = vadd.f32 1.0, %v586_v7  ;;  %v261_v18 = vmul.f32 %v257_v8, %v229_v13 }
 0x129   :  { %v588_v10 = vpop.eup %587  ;;  %v260_v20 = vmul.f32 %v256_v12, %v228_v16 }
 0x12a   :  { %v259_v15 = vadd.f32 1.0, %v588_v10  ;;  %v262_v17 = vmul.f32 %v258_v9, %v230_v11 }
 0x12c   :  { %v263_v19 = vmul.f32 %v259_v15, %v231_v14  ;;  %v266_v22 = vpack.c.bf16 %v262_v17, %v260_v20 }
 0x12e   :  { %v267_v21 = vpack.c.bf16 %v263_v19, %v261_v18 }
 0x130   :  { %428 = vmatprep.mubr.bf16.mxu1 %v267_v21 }
 0x131   :  { %429 = vmatmul.mubr.bf16.vlgmr.msra.gmra.mxu1 %v266_v22 }
 0x1f1   :  { %v525_v23 = vpop.f32.mrf.mxu1 }
 0x1f3   :  { %v526_v24 = vpop.f32.mrf.mxu1 }
 0x1f4   :  { %v527_v26 = vadd.f32 %v526_v24, %v525_v23 }
 0x1f5   :  { %v528_v27 = vpop.f32.mrf.mxu1 }
 0x1f6   :  { %v453_v28 = vadd.f32 %v527_v26, %v508_v25 }
 0x1f7   :  { %v529_v29 = vpop.f32.mrf.mxu1 }
 0x1f8   :  { %455 = vst [vmem:[#allocation9] sm:$0xff] %v453_v28  ;;  %v530_v30 = vadd.f32 %v529_v29, %v528_v27 }
 0x1fa   :  { %v454_v31 = vadd.f32 %v530_v30, %v508_v25 }
 0x1fc   :  { %456 = vst [vmem:[#allocation9 + $0x8] sm:$0xff] %v454_v31 }
 0x1fd   :  { %660 = shalt.err (!%p657_p5)
}
 0x1fe   :  { %468 = dma.vmem_to_hbm [thread:$0]  %s463_s13, 256, %s743_s5, [#allocation5], %s676_s21, %s676_s21, %s677_s22  }
 0x1ff   :  { %673 = dma.done.wait [#allocation5], 256  }
 0x200   :  { %674 = vsyncadd [#allocation5], 4294967040 }
 0x201   :  { %472 = vsyncpa [#allocation4], 1 }
 0x202   :  { %473 = vsyncpa [#allocation7], 1 }
 0x203   :  { %474 = vsyncpa [#allocation5], 1 }

</bundles_post_ra>
